<compile_context>
chip_gen: v5e
topology: v5e:2x2
jax: 0.10.0
libtpu: 0.0.40
codegen_flags: <defaults>
</compile_context>

<pallas_src>
import functools

import jax
import jax.numpy as jnp
from jax import lax
from jax.experimental import pallas as pl
from jax.experimental.pallas import tpu as pltpu

_EPS = 1e-8
_NEG = -1e30            # finite "minus infinity" for masked logits
_LANES = 128
_SUBLANES = 8
_MAX_BATCH_TILE = 256   # rows per batch tile: keeps VMEM bounded, v7x-safe


def _round_up(x, m):
    return ((x + m - 1) // m) * m


def _coherence_kernel(classes_ref, prev_ref, lt_ref, h_ref, out_ref, *,
                      use_soft_labels, batch, b_tile, c_pad, mask_rows):
    """One grid step = (stage pair i, batch tile bt).

    classes_ref : SMEM int32[num_stages]     true class count per stage
    prev_ref    : VMEM (1, b_tile, c_pad)    logits[t-1] (or soft labels[t-1])
    lt_ref      : VMEM (1, b_tile, c_pad)    logits[t]
    h_ref       : VMEM (1, c_pad, c_pad)     H[t-1], zero padded
    out_ref     : VMEM (1, 8, 128)           per-pair KL (scalar broadcast)
    """
    i = pl.program_id(0)            # stage-pair index (t = i + 1)
    bt = pl.program_id(1)           # batch-tile index
    c_prev = classes_ref[i]
    c_t = classes_ref[i + 1]

    col = lax.broadcasted_iota(jnp.int32, (b_tile, c_pad), 1)
    mask_t = col < c_t

    # log_softmax(logits_t) computed directly: avoids materializing softmax and
    # then taking its log (saves one EUP log + one reciprocal per element, and
    # never produces -inf on underflow).
    lt = jnp.where(mask_t, lt_ref[0].astype(jnp.float32), _NEG)
    m_t = jnp.max(lt, axis=1, keepdims=True)
    lse_t = jnp.log(jnp.sum(jnp.exp(lt - m_t), axis=1, keepdims=True))
    log_p_t = (lt - m_t) - lse_t

    prev = prev_ref[0].astype(jnp.float32)
    mask_prev = col < c_prev
    if use_soft_labels:
        p_prev = jnp.where(mask_prev, prev, 0.0)
    else:
        pv = jnp.where(mask_prev, prev, _NEG)
        m_p = jnp.max(pv, axis=1, keepdims=True)
        e_p = jnp.exp(pv - m_p)
        # approx=True (EUP vrcp) was evaluated but its ~2^-12 relative error on
        # the row sum shifts the KL by ~1e-4, outside the 1e-5 validation
        # tolerance vs. the exact-softmax reference; exact reciprocal is kept.
        p_prev = e_p * pl.reciprocal(
            jnp.sum(e_p, axis=1, keepdims=True), approx=False)

    # P_adj = clamp(P_prev @ H, eps) -- MXU dot with f32 accumulation.
    # H is fed in its input dtype (no explicit up-cast).
    p_adj = jnp.dot(p_prev, h_ref[0], preferred_element_type=jnp.float32)
    p_adj = jnp.maximum(p_adj, _EPS)

    # F.kl_div(log_p_t, p_adj, reduction='batchmean') summed over this tile.
    kl_terms = p_adj * (jnp.log(p_adj) - log_p_t)
    valid = mask_t
    if mask_rows:
        row = lax.broadcasted_iota(jnp.int32, (b_tile, 1), 0)
        valid = jnp.logical_and(valid, bt * b_tile + row < batch)
    partial = jnp.sum(jnp.where(valid, kl_terms, 0.0)) * (1.0 / batch)

    # Accumulate into the resident output block (same block index across bt).
    @pl.when(bt == 0)
    def _():
        out_ref[...] = jnp.zeros_like(out_ref)
    out_ref[...] += partial


def coherence_loss(logits, labels, H_matrices, beta, use_soft_labels=False):
    """JAX/Pallas equivalent of CoherenceLoss.forward.

    logits     : list of [B, C_t] arrays (one per stage)
    labels     : list of [B, C_t] arrays (soft labels; used when
                 use_soft_labels=True in place of softmax(logits[t-1]))
    H_matrices : list of [C_{t-1}, C_t] arrays
    beta       : list/array of per-stage scalars (beta[0] unused)
    """
    num_stages = len(logits)
    num_pairs = num_stages - 1
    if num_pairs <= 0:
        return jnp.float32(0.0)

    batch = logits[0].shape[0]
    assert all(l.shape[0] == batch for l in logits), (
        "all stages must share the batch size (batchmean semantics)")
    classes = [l.shape[1] for l in logits]
    c_pad = _round_up(max(classes), _LANES)

    bp = _round_up(batch, _SUBLANES)
    if bp <= _MAX_BATCH_TILE:
        b_tile = bp
    else:
        b_tile = _MAX_BATCH_TILE
        bp = _round_up(batch, _MAX_BATCH_TILE)
    n_bt = bp // b_tile
    # TODO(synk): for very large class counts, H (c_pad x c_pad) should also be
    # tiled along its class dims; at typical stage sizes it fits VMEM easily.

    def pad2(x, rows, cols):
        return jnp.pad(x, ((0, rows - x.shape[0]), (0, cols - x.shape[1])))

    prev_src = labels if use_soft_labels else logits
    prev_stack = jnp.stack([pad2(prev_src[t], bp, c_pad)
                            for t in range(num_pairs)])
    lt_stack = jnp.stack([pad2(logits[t + 1], bp, c_pad)
                          for t in range(num_pairs)])
    h_stack = jnp.stack([pad2(H_matrices[t], c_pad, c_pad)
                         for t in range(num_pairs)])
    classes_arr = jnp.asarray(classes, dtype=jnp.int32)

    kernel = functools.partial(
        _coherence_kernel,
        use_soft_labels=use_soft_labels,
        batch=batch,
        b_tile=b_tile,
        c_pad=c_pad,
        mask_rows=(bp != batch),
    )

    flops = sum(2 * batch * classes[t] * classes[t + 1]
                + 8 * batch * classes[t + 1] for t in range(num_pairs))
    transcendentals = sum(batch * (classes[t] + 2 * classes[t + 1])
                          for t in range(num_pairs))
    bytes_accessed = int(
        prev_stack.size * prev_stack.dtype.itemsize
        + lt_stack.size * lt_stack.dtype.itemsize
        + h_stack.size * h_stack.dtype.itemsize
        + num_pairs * _SUBLANES * _LANES * 4)

    kl = pl.pallas_call(
        kernel,
        out_shape=jax.ShapeDtypeStruct((num_pairs, _SUBLANES, _LANES),
                                       jnp.float32),
        grid_spec=pltpu.PrefetchScalarGridSpec(
            num_scalar_prefetch=1,
            grid=(num_pairs, n_bt),
            in_specs=[
                pl.BlockSpec((1, b_tile, c_pad), lambda i, bt, cls: (i, bt, 0)),
                pl.BlockSpec((1, b_tile, c_pad), lambda i, bt, cls: (i, bt, 0)),
                # H: constant block index across batch tiles -> resident in VMEM.
                pl.BlockSpec((1, c_pad, c_pad), lambda i, bt, cls: (i, 0, 0)),
            ],
            out_specs=pl.BlockSpec((1, _SUBLANES, _LANES),
                                   lambda i, bt, cls: (i, 0, 0)),
        ),
        compiler_params=pltpu.CompilerParams(
            dimension_semantics=("parallel", "arbitrary")),
        cost_estimate=pl.CostEstimate(
            flops=int(flops),
            transcendentals=int(transcendentals),
            bytes_accessed=bytes_accessed),
    )(classes_arr, prev_stack, lt_stack, h_stack)

    beta_vec = jnp.asarray(beta, dtype=jnp.float32)[1:]
    return jnp.dot(beta_vec, kl[:, 0, 0])


def coherence_loss_reference(logits, labels, H_matrices, beta,
                             use_soft_labels=False):
    """Pure-JAX reference (mirrors the PyTorch forward).

    log_softmax == softmax().log() up to float rounding (and avoids -inf).
    """
    total = 0.0
    for t in range(1, len(logits)):
        log_p_t = jax.nn.log_softmax(logits[t].astype(jnp.float32), axis=1)
        if use_soft_labels:
            p_prev = labels[t - 1].astype(jnp.float32)
        else:
            p_prev = jax.nn.softmax(logits[t - 1].astype(jnp.float32), axis=1)
        p_adj = jnp.maximum(p_prev @ H_matrices[t - 1].astype(jnp.float32),
                            _EPS)
        kl = jnp.sum(p_adj * (jnp.log(p_adj) - log_p_t))
        total = total + beta[t] * kl / logits[t].shape[0]
    return total


if __name__ == "__main__":
    num_stages = 3
    batch = 8
    classes = [16, 32, 64]          # C_0, C_1, C_2
    beta = [0.0, 0.5, 1.5]          # beta[0] unused (loop starts at t=1)

    key = jax.random.PRNGKey(0)
    keys = jax.random.split(key, 2 * num_stages + (num_stages - 1))

    # Per-stage logits [B, C_t]
    logits = [
        jax.random.normal(keys[t], (batch, classes[t]), dtype=jnp.float32)
        for t in range(num_stages)
    ]
    # Soft labels (valid distributions), only used when use_soft_labels=True
    labels = [
        jax.nn.softmax(
            jax.random.normal(keys[num_stages + t], (batch, classes[t]),
                              dtype=jnp.float32),
            axis=1)
        for t in range(num_stages)
    ]
    # H matrices [C_{t-1}, C_t], row-stochastic so P_adj stays a distribution
    H_matrices = [
        jax.nn.softmax(
            jax.random.normal(keys[2 * num_stages + t],
                              (classes[t], classes[t + 1]),
                              dtype=jnp.float32),
            axis=1)
        for t in range(num_stages - 1)
    ]

    out = coherence_loss(logits, labels, H_matrices, beta,
                         use_soft_labels=False)
    out = jax.block_until_ready(out)
    ref = coherence_loss_reference(logits, labels, H_matrices, beta,
                                   use_soft_labels=False)
    assert jnp.allclose(out, ref, rtol=1e-5, atol=1e-5), (out, ref)

    # Soft-label path.
    out_soft = jax.block_until_ready(
        coherence_loss(logits, labels, H_matrices, beta, use_soft_labels=True))
    ref_soft = coherence_loss_reference(logits, labels, H_matrices, beta,
                                        use_soft_labels=True)
    assert jnp.allclose(out_soft, ref_soft, rtol=1e-5, atol=1e-5), (
        out_soft, ref_soft)

    print("KERNEL_OK")
</pallas_src>

<mosaic_0001>
module attributes {stable_mosaic.version = 11 : i64} {
  func.func @_coherence_kernel(%arg0: i32, %arg1: i32, %arg2: memref<3xi32, #tpu.memory_space<smem>>, %arg3: memref<1x8x128xf32, #tpu.memory_space<vmem>>, %arg4: memref<1x8x128xf32, #tpu.memory_space<vmem>>, %arg5: memref<1x128x128xf32, #tpu.memory_space<vmem>>, %arg6: memref<1x8x128xf32, #tpu.memory_space<vmem>>) attributes {dimension_semantics = [#tpu.dimension_semantics<parallel>, #tpu.dimension_semantics<arbitrary>], iteration_bounds = array<i64: 2, 1>, scalar_prefetch = 1 : i64, scratch_operands = 0 : i64, tpu.core_type = #tpu.core_type<tc>, window_params = [{transform_indices = @transform_0, window_bounds = array<i64: 1, 8, 128>}, {transform_indices = @transform_1, window_bounds = array<i64: 1, 8, 128>}, {transform_indices = @transform_2, window_bounds = array<i64: 1, 128, 128>}, {transform_indices = @transform_3, window_bounds = array<i64: 1, 8, 128>}]} {
    %0 = arith.index_cast %arg0 : i32 to index
    %1 = memref.load %arg2[%0] : memref<3xi32, #tpu.memory_space<smem>>
    %c1_i32 = arith.constant 1 : i32
    %2 = arith.addi %arg0, %c1_i32 : i32
    %3 = arith.index_cast %2 : i32 to index
    %4 = memref.load %arg2[%3] : memref<3xi32, #tpu.memory_space<smem>>
    %5 = tpu.iota {dimensions = array<i32: 1>} : vector<8x128xi32>
    %6 = vector.broadcast %4 : i32 to vector<8x128xi32>
    %7 = arith.cmpi slt, %5, %6 : vector<8x128xi32>
    %c0 = arith.constant 0 : index
    %c0_0 = arith.constant 0 : index
    %c0_1 = arith.constant 0 : index
    %8 = vector.load %arg4[%c0, %c0_0, %c0_1] : memref<1x8x128xf32, #tpu.memory_space<vmem>>, vector<1x8x128xf32>
    %9 = vector.shape_cast %8 : vector<1x8x128xf32> to vector<8x128xf32>
    %cst = arith.constant -1.000000e+30 : f32
    %10 = vector.broadcast %cst : f32 to vector<8x128xf32>
    %11 = arith.select %7, %9, %10 : vector<8x128xi1>, vector<8x128xf32>
    %cst_2 = arith.constant dense<0xFF800000> : vector<8xf32>
    %12 = vector.multi_reduction <maximumf>, %11, %cst_2 [1] : vector<8x128xf32> to vector<8xf32>
    %13 = vector.shape_cast %12 : vector<8xf32> to vector<8x1xf32>
    %14 = vector.broadcast %13 : vector<8x1xf32> to vector<8x128xf32>
    %15 = arith.subf %11, %14 : vector<8x128xf32>
    %16 = math.exp %15 : vector<8x128xf32>
    %cst_3 = arith.constant dense<0.000000e+00> : vector<8xf32>
    %17 = vector.multi_reduction <add>, %16, %cst_3 [1] : vector<8x128xf32> to vector<8xf32>
    %18 = vector.shape_cast %17 : vector<8xf32> to vector<8x1xf32>
    %19 = math.log %18 : vector<8x1xf32>
    %20 = vector.broadcast %13 : vector<8x1xf32> to vector<8x128xf32>
    %21 = arith.subf %11, %20 : vector<8x128xf32>
    %22 = vector.broadcast %19 : vector<8x1xf32> to vector<8x128xf32>
    %23 = arith.subf %21, %22 : vector<8x128xf32>
    %c0_4 = arith.constant 0 : index
    %c0_5 = arith.constant 0 : index
    %c0_6 = arith.constant 0 : index
    %24 = vector.load %arg3[%c0_4, %c0_5, %c0_6] : memref<1x8x128xf32, #tpu.memory_space<vmem>>, vector<1x8x128xf32>
    %25 = vector.shape_cast %24 : vector<1x8x128xf32> to vector<8x128xf32>
    %26 = vector.broadcast %1 : i32 to vector<8x128xi32>
    %27 = arith.cmpi slt, %5, %26 : vector<8x128xi32>
    %cst_7 = arith.constant -1.000000e+30 : f32
    %28 = vector.broadcast %cst_7 : f32 to vector<8x128xf32>
    %29 = arith.select %27, %25, %28 : vector<8x128xi1>, vector<8x128xf32>
    %cst_8 = arith.constant dense<0xFF800000> : vector<8xf32>
    %30 = vector.multi_reduction <maximumf>, %29, %cst_8 [1] : vector<8x128xf32> to vector<8xf32>
    %31 = vector.shape_cast %30 : vector<8xf32> to vector<8x1xf32>
    %32 = vector.broadcast %31 : vector<8x1xf32> to vector<8x128xf32>
    %33 = arith.subf %29, %32 : vector<8x128xf32>
    %34 = math.exp %33 : vector<8x128xf32>
    %cst_9 = arith.constant dense<0.000000e+00> : vector<8xf32>
    %35 = vector.multi_reduction <add>, %34, %cst_9 [1] : vector<8x128xf32> to vector<8xf32>
    %36 = vector.shape_cast %35 : vector<8xf32> to vector<8x1xf32>
    %37 = tpu.reciprocal %36 : vector<8x1xf32> -> vector<8x1xf32>
    %38 = vector.broadcast %37 : vector<8x1xf32> to vector<8x128xf32>
    %39 = arith.mulf %34, %38 : vector<8x128xf32>
    %c0_10 = arith.constant 0 : index
    %c0_11 = arith.constant 0 : index
    %c0_12 = arith.constant 0 : index
    %40 = vector.load %arg5[%c0_10, %c0_11, %c0_12] : memref<1x128x128xf32, #tpu.memory_space<vmem>>, vector<1x128x128xf32>
    %41 = vector.shape_cast %40 : vector<1x128x128xf32> to vector<128x128xf32>
    %cst_13 = arith.constant dense<0.000000e+00> : vector<8x128xf32>
    %42 = tpu.matmul %39, %41, %cst_13 {dimension_numbers = #tpu.dot_dimension_numbers<[1], [0], [0], [1], [0, 0, 1, 1], [], []>} : vector<8x128xf32>, vector<128x128xf32>, vector<8x128xf32> -> vector<8x128xf32>
    %cst_14 = arith.constant 9.99999993E-9 : f32
    %43 = vector.broadcast %cst_14 : f32 to vector<8x128xf32>
    %44 = arith.maximumf %42, %43 : vector<8x128xf32>
    %45 = math.log %44 : vector<8x128xf32>
    %46 = arith.subf %45, %23 : vector<8x128xf32>
    %47 = arith.mulf %44, %46 : vector<8x128xf32>
    %cst_15 = arith.constant 0.000000e+00 : f32
    %48 = vector.broadcast %cst_15 : f32 to vector<8x128xf32>
    %49 = arith.select %7, %47, %48 : vector<8x128xi1>, vector<8x128xf32>
    %50 = vector.shape_cast %49 : vector<8x128xf32> to vector<1x8x128xf32>
    %cst_16 = arith.constant dense<0.000000e+00> : vector<1xf32>
    %51 = vector.multi_reduction <add>, %50, %cst_16 [1, 2] : vector<1x8x128xf32> to vector<1xf32>
    %52 = vector.shape_cast %51 : vector<1xf32> to vector<1x1x1xf32>
    %53 = vector.extract %52[0, 0, 0] : f32 from vector<1x1x1xf32>
    %cst_17 = arith.constant 1.250000e-01 : f32
    %54 = arith.mulf %53, %cst_17 : f32
    %c0_i32 = arith.constant 0 : i32
    %55 = arith.cmpi eq, %arg1, %c0_i32 : i32
    %56 = arith.extui %55 : i1 to i32
    %c0_i32_18 = arith.constant 0 : i32
    %57 = arith.cmpi ne, %56, %c0_i32_18 : i32
    scf.if %57 {
      %cst_25 = arith.constant 0.000000e+00 : f32
      %62 = vector.broadcast %cst_25 : f32 to vector<1x8x128xf32>
      %c0_26 = arith.constant 0 : index
      %c0_27 = arith.constant 0 : index
      %c0_28 = arith.constant 0 : index
      %63 = vector.load %arg6[%c0_26, %c0_27, %c0_28] : memref<1x8x128xf32, #tpu.memory_space<vmem>>, vector<1x8x128xf32>
      tpu.vector_store %arg6[%c0_26, %c0_27, %c0_28], %62 {strides = array<i32>} : memref<1x8x128xf32, #tpu.memory_space<vmem>>, vector<1x8x128xf32>,
    } else {
    }
    %c0_19 = arith.constant 0 : index
    %c0_20 = arith.constant 0 : index
    %c0_21 = arith.constant 0 : index
    %58 = vector.load %arg6[%c0_19, %c0_20, %c0_21] : memref<1x8x128xf32, #tpu.memory_space<vmem>>, vector<1x8x128xf32>
    %59 = vector.broadcast %54 : f32 to vector<1x8x128xf32>
    %60 = arith.addf %58, %59 : vector<1x8x128xf32>
    %c0_22 = arith.constant 0 : index
    %c0_23 = arith.constant 0 : index
    %c0_24 = arith.constant 0 : index
    %61 = vector.load %arg6[%c0_22, %c0_23, %c0_24] : memref<1x8x128xf32, #tpu.memory_space<vmem>>, vector<1x8x128xf32>
    tpu.vector_store %arg6[%c0_22, %c0_23, %c0_24], %60 {strides = array<i32>} : memref<1x8x128xf32, #tpu.memory_space<vmem>>, vector<1x8x128xf32>,
    return
  }
  func.func @transform_0(%arg0: i32, %arg1: i32, %arg2: memref<3xi32, #tpu.memory_space<smem>>) -> (i32, i32, i32) {
    %c0_i32 = arith.constant 0 : i32
    %c0_i32_0 = arith.constant 0 : i32
    return %arg0, %arg1, %c0_i32 : i32, i32, i32
  }
  func.func @transform_1(%arg0: i32, %arg1: i32, %arg2: memref<3xi32, #tpu.memory_space<smem>>) -> (i32, i32, i32) {
    %c0_i32 = arith.constant 0 : i32
    %c0_i32_0 = arith.constant 0 : i32
    return %arg0, %arg1, %c0_i32 : i32, i32, i32
  }
  func.func @transform_2(%arg0: i32, %arg1: i32, %arg2: memref<3xi32, #tpu.memory_space<smem>>) -> (i32, i32, i32) {
    %c0_i32 = arith.constant 0 : i32
    %c0_i32_0 = arith.constant 0 : i32
    %c0_i32_1 = arith.constant 0 : i32
    return %arg0, %c0_i32, %c0_i32_0 : i32, i32, i32
  }
  func.func @transform_3(%arg0: i32, %arg1: i32, %arg2: memref<3xi32, #tpu.memory_space<smem>>) -> (i32, i32, i32) {
    %c0_i32 = arith.constant 0 : i32
    %c0_i32_0 = arith.constant 0 : i32
    %c0_i32_1 = arith.constant 0 : i32
    return %arg0, %c0_i32, %c0_i32_0 : i32, i32, i32
  }
}

</mosaic_0001>

<bundles_post_ra>
// kernel: tpu_custom_call.1
= control target key start
LH: loop header
LB: loop body
LE: loop exit
PB: predicated region body
PF: predicated region fallthrough
CT: control target
= control target key end

     0   :  { %s839_s18 = smov [#allocation3]   ;;  %s1062_s0 = inlined_call_operand.hbm [shape: s32[3], index: 0, kind: input, shape index: {}]   ;;  %s1063_s1 = inlined_call_operand.hbm [shape: f32[2,8,128], index: 1, kind: input, shape index: {}]   ;;  %s1064_s2 = inlined_call_operand.hbm [shape: f32[2,8,128], index: 2, kind: input, shape index: {}]   ;;  %s1065_s3 = inlined_call_operand.hbm [shape: f32[2,128,128], index: 3, kind: input, shape index: {}]   ;;  %s1066_s4 = inlined_call_operand.hbm [shape: f32[2,8,128], index: 4, kind: output, shape index: {}]  }
   0x1   :  { %1072 = sst [smem:[#allocation20_spill]] %s1064_s2  ;;  %s10_s17 = sshll.u32 %s1062_s0, 4  ;;  %s11_s17 = int_to_ptr.hbm [resolvable:$true] %s10_s17 }
   0x2   :  { %13 = dma.hbm_to_smem %s11_s17, 16, %s839_s18, [#allocation2] }
   0x3   :  { %801 = dma.done.wait [#allocation2], 16 }
   0x4   :  { %802 = vsyncadd [#allocation2], 4294967280 }
   0x5   :  { %16 = sfence }
   0x6   :  { %17 = vsyncpa [#allocation5], 0 }
   0x7   :  { %19 = vsyncpa [#allocation5 + $0x1], 0 }
   0x8   :  { %20 = vsyncpa [#allocation8], 0 }
   0x9   :  { %22 = vsyncpa [#allocation8 + $0x1], 0 }
   0xa   :  { %23 = vsyncpa [#allocation6], 0 }
   0xb   :  { %25 = vsyncpa [#allocation6 + $0x1], 0  ;;  %s870_s19 = smov 0   ;;  %s872_s20 = smov 0  }
   0xc   :  { %s874_s21 = smov 0   ;;  %s876_s22 = smov 0  }
   0xd   :  { %s878_s0 = smov 0   ;;  %s880_s23 = smov 0  }
   0xe LB: > { %1073 = sst [smem:[#allocation15_spill]] %s825_s21  ;;  %s901_s24 = sadd.s32 4294967295, %s837_s23   ;;  %s837_s23 = sphi %s880_s23, %s31_s23   ;;  %s833_s0 = sphi %s878_s0, %s1095_s0   ;;  %s829_s22 = sphi %s876_s22, %s1094_s22   ;;  %s825_s21 = sphi %s874_s21, %s1090_s21   ;;  %s821_s20 = sphi %s872_s20, %s1093_s20   ;;  %s817_s19 = sphi %s870_s19, %s1092_s19  }
   0xf   : > { %1074 = sst [smem:[#allocation16_spill]] %s837_s23  ;;  %s539_s25 = sadd.s32 4294967294, %s837_s23  }
  0x10   : > { %s43_s26 = sadd.s32 1, %s833_s0  ;;  %s52_s27 = sadd.s32 1, %s825_s21 }
  0x11   : > { %p45_p0 = scmp.ge.s32.totalorder %s43_s26, 2  ;;  %p59_p1 = scmp.ne.s32.totalorder %s825_s21, %s821_s20 }
  0x12   : > { %p60_p2 = scmp.eq.s32.totalorder %s837_s23, 0  ;;  %p65_p3 = scmp.ne.s32.totalorder %s821_s20, %s817_s19 }
  0x13   : > { %s1097_s26 = smov (%p45_p0, %s43_s26), 0  ;;  %p66_p5 = scmp.eq.s32.totalorder %s901_s24, 0 }
  0x14   : > { %1075 = sst [smem:[#allocation17_spill]] %s1097_s26  ;;  %p913_p4 = por %p60_p2, %p59_p1 }
  0x15   : > { %s47_s29 = ssub.s32 %s833_s0, %s1097_s26  ;;  %p143_p6 = scmp.eq.s32.totalorder %s901_s24, 1 }
  0x16   : > { %p50_p7 = scmp.eq.s32.totalorder %s47_s29, 0  ;;  %p921_p8 = por %p66_p5, %p65_p3 }
  0x17   : > { %p925_p9 = por %p143_p6, %p59_p1  ;;  %p149_p10 = scmp.eq.s32.totalorder %s539_s25, 1 }
  0x18   : > { %s930_s6 = scalar_select %p50_p7, %s825_s21, %s52_s27  }
  0x19   : > { %p932_p11 = por %p149_p10, %p65_p3  ;;  %p541_p12 = scmp.ge.s32.totalorder %s837_s23, 2 }
  0x1a   : > { %1079 = sst [smem:[#allocation18_spill]] %s930_s6  ;;  %p583_p13 = scmp.lt.s32.totalorder %s837_s23, 2 }
  0x1b   : > { %s1080_s7 = scalar_select %p932_p11, 1, 0 }
  0x1c   : > { %s939_s8 = sand.u32 1, %s825_s21   ;;  %s543_s10 = sshll.u32 %s833_s0, 3 }
  0x1d   : > { %1081 = sst [smem:[#allocation19_spill]] %s1080_s7  ;;  %s542_s9 = sshll.u32 %s939_s8, 3 }
  0x1e   : > { %p945_p0 = pnand %p583_p13, %p913_p4  ;;  %s189_s12 = sand.u32 1, %s837_s23  }
  0x1f   : > { %s1083_s2 = sld [smem:[#allocation20_spill]]  ;;  %s193_s17 = scalar_lea.vmem [#allocation7], %s542_s9 }
  0x20   : > { %s202_s18 = sshll.u32 %s193_s17, 4  ;;  %s190_s25 = scalar_lea.sflag [#allocation8], %s189_s12  ;;  %s203_s18 = int_to_ptr.vmem [resolvable:$true] %s202_s18 }
  0x21   : > { %s546_s27 = sshll.u32 %s939_s8, 7  ;;  %p549_p1 = scmp.ge.s32.totalorder %s837_s23, 1 }
  0x22   : > { %p229_p2 = scmp.lt.s32.totalorder %s837_s23, 3  ;;  %s213_s28 = scalar_lea.vmem [#allocation9], %s546_s27 }
  0x23   : > { %s221_s29 = sshll.u32 %s213_s28, 4  ;;  %s178_s17 = scalar_lea.hbm %s1063_s1, %s543_s10  ;;  %s222_s29 = int_to_ptr.vmem [resolvable:$true] %s221_s29 }
  0x24   : > { %p958_p3 = pnand %p549_p1, %p229_p2  ;;  %s180_s12 = sshll.u32 %s178_s17, 4  ;;  %s181_s12 = int_to_ptr.hbm [resolvable:$true] %s180_s12 }
  0x25   : > { %s198_s15 = scalar_lea.hbm %s1083_s2, %s543_s10  ;;  %s173_s2 = scalar_lea.vmem [#allocation4], %s542_s9 }
  0x26   : > { %s200_s16 = sshll.u32 %s198_s15, 4  ;;  %s182_s26 = sshll.u32 %s173_s2, 4  ;;  %s201_s16 = int_to_ptr.hbm [resolvable:$true] %s200_s16  ;;  %s183_s26 = int_to_ptr.vmem [resolvable:$true] %s182_s26 }
  0x27   : > { %575 = dma.hbm_to_vmem [thread:$0]  (!%p945_p0), %s201_s16, 128, %s203_s18, %s190_s25  }
  0x28   : > { %s170_s16 = scalar_lea.sflag [#allocation5], %s939_s8  ;;  %s558_s18 = sshll.u32 %s833_s0, 7 }
  0x29   : > { %572 = dma.hbm_to_vmem [thread:$0]  (!%p945_p0), %s181_s12, 128, %s183_s26, %s170_s16  }
  0x2a   : > { %s218_s6 = scalar_lea.hbm %s1065_s3, %s558_s18  ;;  %s840_s23 = smov 128  }
  0x2b   : > { %s219_s21 = sshll.u32 %s218_s6, 4  ;;  %s841_s7 = smov 8   ;;  %s220_s21 = int_to_ptr.hbm [resolvable:$true] %s219_s21 }
  0x2c   : > { %578 = dma.hbm_to_vmem [thread:$0]  (!%p945_p0), %s220_s21, 2048, %s222_s29, %s190_s25, %s840_s23, %s840_s23, %s841_s7  }
  0x2d   : > { %233 = sbr.rel (%p958_p3) target bundleno = 651 (0x28b), region = 32  ;;  %s977_s2 = sand.u32 (!%p958_p3), 1, %s821_s20  }
  0x2e   : > { %s980_s26 = sshll.u32 (!%p958_p3), %s977_s2, 3  ;;  %s236_s8 = scalar_lea.sflag (!%p958_p3), [#allocation5], %s977_s2 }
  0x2f   : > { %s239_s9 = scalar_lea.vmem (!%p958_p3), [#allocation4], %s980_s26 }
  0x32   : > { %804 = dma.done.wait (%p921_p8), %s236_s8, 128  }
  0x33   : > { %806 = vsyncadd (%p921_p8), %s236_s8, 4294967168  ;;  %s245_s21 = sand.u32 1, %s901_s24   ;;  %s249_s6 = scalar_lea.vmem [#allocation7], %s980_s26 }
  0x34   : > { %s246_s23 = scalar_lea.sflag [#allocation8], %s245_s21 }
  0x35   : > { %808 = dma.done.wait (%p921_p8), %s246_s23, 2176  }
  0x36   : > { %810 = vsyncadd (%p921_p8), %s246_s23, 4294965120  ;;  %v296_v0 = vlaneseq  ;;  %s294_s7 = sadd.s32 1, %s829_s22  ;;  %s293_s10 = sld [smem:[#allocation3 + %s829_s22]]  ;;  %v312_v2 = vld [vmem:[%s239_s9] sm:$0xff]  ;;  %v300_v4 = vld [vmem:[%s249_s6] sm:$0xff] }
  0x37   : > { %s295_s11 = sld [smem:[#allocation3 + %s294_s7]]  ;;  %s552_s24 = sshll.u32 %s977_s2, 7 }
  0x38   : > { %v297_v1 = vand.u32 127, %v296_v0  ;;  %s1003_s30 = scalar_lea.vmem [#allocation9], %s552_s24  ;;  %s555_s25 = sshll.u32 %s829_s22, 3 }
  0x39   : > { %v353_v9 = vld [vmem:[%s1003_s30 + $0x78] sm:$0xff]  ;;  %v352_v10 = vld [vmem:[%s1003_s30 + $0x70] sm:$0xff]  ;;  %v351_v11 = vld [vmem:[%s1003_s30 + $0x68] sm:$0xff]  ;;  %s410_s14 = scalar_lea.hbm %s1066_s4, %s555_s25  ;;  %s292_s17 = scalar_lea.vmem [#allocation10], %s980_s26 }
  0x3a   : > { %354 = vmatpush.msra.mxu0 %v353_v9  ;;  %v350_v12 = vld [vmem:[%s1003_s30 + $0x60] sm:$0xff]  ;;  %v349_v13 = vld [vmem:[%s1003_s30 + $0x58] sm:$0xff]  ;;  %v348_v14 = vld [vmem:[%s1003_s30 + $0x50] sm:$0xff]  ;;  %s412_s12 = sshll.u32 %s292_s17, 4  ;;  %s414_s18 = sshll.u32 %s410_s14, 4  ;;  %s413_s12 = int_to_ptr.vmem [resolvable:$true] %s412_s12  ;;  %s415_s18 = int_to_ptr.hbm [resolvable:$true] %s414_s18 }
  0x3b   : > { %v347_v23 = vld [vmem:[%s1003_s30 + $0x48] sm:$0xff]  ;;  %v346_v24 = vld [vmem:[%s1003_s30 + $0x40] sm:$0xff]  ;;  %v345_v25 = vld [vmem:[%s1003_s30 + $0x38] sm:$0xff]  ;;  %s400_s27 = scalar_lea.sflag [#allocation6], %s977_s2  ;;  %s763_s28 = sshra.s32 %s415_s18, 4  ;;  %s764_s28 = int_to_ptr.hbm [resolvable:$true] %s763_s28 }
  0x3c   : > { %v313_v3 = vstv %s293_s10  ;;  %355 = vmatpush.msra.mxu0 %v352_v10  ;;  %v344_v26 = vld [vmem:[%s1003_s30 + $0x30] sm:$0xff]  ;;  %v343_v27 = vld [vmem:[%s1003_s30 + $0x28] sm:$0xff]  ;;  %v342_v28 = vld [vmem:[%s1003_s30 + $0x20] sm:$0xff]  ;;  %s765_s8 = scalar_lea.hbm %s764_s28, 8  ;;  %s769_s21 = scalar_lea.hbm %s1066_s4, 16 }
  0x3d   : > { %vm314_vm0 = vcmp.lt.s32.totalorder %v297_v1, %v313_v3  ;;  %v298_v5 = vstv %s295_s11  ;;  %v341_v29 = vld [vmem:[%s1003_s30 + $0x18] sm:$0xff]  ;;  %v340_v30 = vld [vmem:[%s1003_s30 + $0x10] sm:$0xff]  ;;  %v339_v31 = vld [vmem:[%s1003_s30 + $0x8] sm:$0xff]  ;;  %p766_p4 = scmp.ne.s32.totalorder %s764_s28, %s765_s8  ;;  %p770_p7 = scmp.lt.s32.totalorder %s764_s28, %s1066_s4 }
  0x3e   : > { %v315_v6 = vsel %vm314_vm0, %v312_v2, -1e+30  ;;  %vm996_vm1 = vcmp.lt.s32.totalorder %v297_v1, %v298_v5  ;;  %356 = vmatpush.msra.mxu0 %v351_v11  ;;  %v338_v32 = vld [vmem:[%s1003_s30] sm:$0xff]  ;;  %p771_p8 = scmp.lt.s32.totalorder %s769_s21, %s765_s8 }
  0x3f   : > { %316 = vmax.xlane.f32.xlu0 %v315_v6  ;;  %v301_v8 = vsel %vm996_vm1, %v300_v4, -1e+30  ;;  %p767_p5 = pnand %p766_p4, %p925_p9 }
  0x40   : > { %302 = vmax.xlane.f32.xlu1 %v301_v8  ;;  %357 = vmatpush.msra.mxu0 %v350_v12  ;;  %p772_p10 = por %p771_p8, %p770_p7 }
  0x41   : > { %p768_p6 = pneg %p767_p5 }
  0x42   : > { %358 = vmatpush.msra.mxu0 %v349_v13 }
  0x43   : > { %p773_p13 = pnand %p772_p10, %p768_p6 }
  0x44   : > { %359 = vmatpush.msra.mxu0 %v348_v14 }
  0x46   : > { %360 = vmatpush.msra.mxu0 %v347_v23 }
  0x48   : > { %361 = vmatpush.msra.mxu0 %v346_v24 }
  0x4a   : > { %362 = vmatpush.msra.mxu0 %v345_v25 }
  0x4c   : > { %363 = vmatpush.msra.mxu0 %v344_v26 }
  0x4e   : > { %364 = vmatpush.msra.mxu0 %v343_v27 }
  0x50   : > { %365 = vmatpush.msra.mxu0 %v342_v28 }
  0x52   : > { %366 = vmatpush.msra.mxu0 %v341_v29 }
  0x54   : > { %367 = vmatpush.msra.mxu0 %v340_v30 }
  0x56   : > { %368 = vmatpush.msra.mxu0 %v339_v31 }
  0x58   : > { %369 = vmatpush.msra.mxu0 %v338_v32 }
  0xb2   : > { %v317_v15 = vpop.xlane.xlu0 %316 }
  0xb3   : > { %v318_v16 = vsub.f32 %v315_v6, %v317_v15  ;;  %v303_v17 = vpop.xlane.xlu1 %302 }
  0xb4   : > { %v304_v18 = vsub.f32 %v301_v8, %v303_v17 }
  0xb5   : > { %v319_v19 = vmul.f32 1.442695, %v318_v16 }
  0xb6   : > { %v305_v20 = vmul.f32 1.442695, %v304_v18 }
  0xb7   : > { %637 = vpow2.f32 %v319_v19 }
  0xb8   : > { %639 = vpow2.f32 %v305_v20 }
  0xbd   : > { %v638_v21 = vpop.eup %637 }
  0xbe   : > { %v640_v22 = vpop.eup %639  ;;  %321 = vadd.xlane.f32.xlu0 %v638_v21 }
  0xbf   : > { %307 = vadd.xlane.f32.xlu1 %v640_v22 }
 0x131   : > { %v322_v33 = vpop.xlane.xlu0 %321 }
 0x132   : > { %641 = vrcp.f32 %v322_v33  ;;  %v334_v37 = vand.u32 2147483648, %v322_v33  ;;  %v332_v39 = vand.u32 2147483647, %v322_v33  ;;  %vm328_vm3 = vweird.f32 %v322_v33  ;;  %v308_v45 = vpop.xlane.xlu1 %307 }
 0x133   : > { %643 = vlog2.f32 %v308_v45 }
 0x134   : > { %v335_v41 = vor.u32 1.1754944e-38, %v334_v37  ;;  %vm333_vm5 = vcmp.eq.f32.partialorder %v332_v39, 8.507059e+37 }
 0x138   : > { %v642_v34 = vpop.eup %641 }
 0x139   : > { %v324_v35 = vmul.f32 %v642_v34, %v322_v33  ;;  %vm329_vm2 = vweird.f32 %v642_v34  ;;  %v644_v48 = vpop.eup %643 }
 0x13a   : > { %vm330_vm4 = vmor %vm328_vm3, %vm329_vm2  ;;  %v310_v49 = vmul.f32 0.6931472, %v644_v48 }
 0x13b   : > { %v325_v36 = vsub.f32 1.0, %v324_v35 }
 0x13c   : > { %v311_v51 = vsub.f32 %v304_v18, %v310_v49 }
 0x13d   : > { %v326_v38 = vmul.f32 %v642_v34, %v325_v36 }
 0x13f   : > { %v327_v40 = vadd.f32 %v642_v34, %v326_v38 }
 0x141   : > { %v331_v42 = vsel %vm330_vm4, %v642_v34, %v327_v40 }
 0x142   : > { %v336_v43 = vsel %vm333_vm5, %v335_v41, %v331_v42 }
 0x143   : > { %v337_v44 = vmul.f32 %v638_v21, %v336_v43 }
 0x145   : > { %370 = vmatmul.f32.vlgmr.msra.gmra.mxu0 %v337_v44 }
 0x1c2   : > { %v371_v46 = vpop.f32.mrf.mxu0 }
 0x1c3   : > { %v374_v47 = vmax.f32 %v371_v46, 1e-08 }
 0x1c5   : > { %645 = vlog2.f32 %v374_v47 }
 0x1cb   : > { %v646_v50 = vpop.eup %645 }
 0x1cc   : > { %v376_v52 = vmul.f32 0.6931472, %v646_v50 }
 0x1ce   : > { %v377_v53 = vsub.f32 %v376_v52, %v311_v51 }
 0x1d0   : > { %v378_v54 = vmul.f32 %v377_v53, %v374_v47 }
 0x1d2   : > { %v379_v55 = vsel %vm996_vm1, %v378_v54, 0.0 }
 0x1d3   : > { %380 = vadd.xlane.f32.xlu2 %v379_v55 }
 0x246   : > { %v381_v56 = vpop.xlane.xlu2 %380 }
 0x247   : > { %v382_v57 = vrot.slane %v381_v56, 4 }
 0x249   : > { %v383_v58 = vadd.f32 %v382_v57, %v381_v56 }
 0x24b   : > { %v384_v59 = vrot.slane %v383_v58, 2 }
 0x24d   : > { %v385_v60 = vadd.f32 %v384_v59, %v383_v58 }
 0x24f   : > { %v386_v61 = vrot.slane %v385_v60, 1 }
 0x251   : > { %v387_v62 = vadd.f32 %v386_v61, %v385_v60 }
 0x253   : > { %559 = vpush %v387_v62 }
 0x284   : > { %s560_s15 = spop %559 }
 0x285   : > { %s389_s16 = smul.f32 0.125, %s560_s15 }
 0x287   : > { %v396_v63 = vstv %s389_s16 }
 0x288   : > { %398 = vst [vmem:[%s292_s17] sm:$0xff] %v396_v63 }
 0x289   : > { %776 = shalt.err (!%p773_p13)
}
 0x28a   : > { %567 = dma.vmem_to_hbm [thread:$0]  (%p925_p9), %s413_s12, 128, %s415_s18, %s400_s27  }
 0x28b PF: > { %s1088_s6 = sld [smem:[#allocation16_spill]]  ;;  %s426_s7 = sand.u32 1, %s817_s19  }
 0x28c   : > { %p580_p0 = pnand %p541_p12, %p932_p11  ;;  %s427_s10 = scalar_lea.sflag [#allocation6], %s426_s7 }
 0x28e   : > { %p581_p1 = pneg %p580_p0 }
 0x290   : > { %812 = dma.done.wait (%p581_p1), %s427_s10, 128  }
 0x291   : > { %814 = vsyncadd (%p581_p1), %s427_s10, 4294967168  ;;  %s31_s23 = sadd.s32 1, %s1088_s6   ;;  %s1089_s11 = sld [smem:[#allocation15_spill]] }
 0x292   : > { %p28_p2 = scmp.ge.s32.totalorder %s31_s23, 4   ;;  %s1090_s21 = sld [smem:[#allocation18_spill]] }
 0x293   : > { %s1091_s5 = sld [smem:[#allocation17_spill]]  ;;  %s1092_s19 = smov %s821_s20 }
 0x294   : > { %s1094_s22 = smov %s833_s0 }
 0x295   :  { %30 = sbr.rel (!%p28_p2) target bundleno = 14 (0xe), region = 105 }
 0x297   : > { %s1093_s20 = smov %s1089_s11 }
 0x299   : > { %s1095_s0 = smov %s1091_s5 }
 0x29a   :  { %433 = vsyncpa [#allocation5], 1 }
 0x29b   :  { %435 = vsyncpa [#allocation5 + $0x1], 1 }
 0x29c   :  { %436 = vsyncpa [#allocation8], 1 }
 0x29d   :  { %438 = vsyncpa [#allocation8 + $0x1], 1 }
 0x29e   :  { %439 = vsyncpa [#allocation6], 1 }
 0x29f   :  { %441 = vsyncpa [#allocation6 + $0x1], 1 }

</bundles_post_ra>
